<compile_context>
chip_gen: v5e
topology: v5e:2x2
jax: 0.10.0
libtpu: 0.0.40
codegen_flags: <defaults>
</compile_context>

<pallas_src>
import functools

import jax
import jax.numpy as jnp
import numpy as np
from jax.experimental import pallas as pl
from jax.experimental.pallas import tpu as pltpu


# Max rows (of 128 lanes) per grid step: 4096 rows = 512K f32 outputs.
# Per step: 6 MiB in + 2 MiB out = 8 MiB; double-buffered working set = 16 MiB.
_MAX_ROWS = 4096


def _round_up(x: int, m: int) -> int:
    return ((x + m - 1) // m) * m


def get_colorshift_weights(rng: np.random.RandomState, mode="uniform", Y=False):
    """Deterministic (seeded) re-implementation of the PyTorch weight sampler."""
    if Y:
        if mode == "normal":
            w = rng.normal(loc=0.0, scale=1.0, size=3)
        else:  # uniform
            w = rng.uniform(low=-1.0, high=1.0, size=3)
    elif mode == "normal":
        w = np.array(
            [
                rng.normal(loc=0.299, scale=0.1),
                rng.normal(loc=0.587, scale=0.1),
                rng.normal(loc=0.114, scale=0.1),
            ]
        )
    else:  # uniform
        w = np.array(
            [
                rng.uniform(low=0.199, high=0.399),
                rng.uniform(low=0.487, high=0.687),
                rng.uniform(low=0.014, high=0.214),
            ]
        )
    return jnp.asarray(w, dtype=jnp.float32)


def _color_shift_kernel(w_ref, img_ref, out_ref):
    # w_ref:   SMEM (3,) f32 scalar prefetch -> pre-normalised effective weights
    # img_ref: VMEM (BN, 3, R_TILE, 128)     -> dense (sublane, lane) tiles per channel
    # out_ref: VMEM (BN, 1, R_TILE, 128)
    w0 = w_ref[0]
    w1 = w_ref[1]
    w2 = w_ref[2]
    r = img_ref[:, 0, :, :]
    g = img_ref[:, 1, :, :]
    b = img_ref[:, 2, :, :]
    if r.dtype != jnp.float32:  # static dtype check; skip casts for f32 inputs
        r = r.astype(jnp.float32)
        g = g.astype(jnp.float32)
        b = b.astype(jnp.float32)
    out_ref[:, 0, :, :] = (w0 * r + w1 * g + w2 * b).astype(out_ref.dtype)


@functools.partial(jax.jit, static_argnames=("Y", "alpha"))
def color_shift_pallas(image: jax.Array, rgb_weights: jax.Array,
                       *, Y: bool = False, alpha: float = 0.8) -> jax.Array:
    """Apply color shift to a NCHW image batch. Returns (N, 1, H, W), same dtype."""
    N, C, H, W = image.shape
    assert C == 3, "ColorShift expects 3 input channels (RGB)"
    HW = H * W
    dtype = image.dtype

    # Fold normalisation (and Y=True grayscale blend) into 3 effective weights.
    # NOTE: as in the PyTorch original, Y=True weights ~ U(-1,1) so sum(w) may be
    # near zero and produce inf/NaN; behavior intentionally mirrors the reference.
    w = rgb_weights.astype(jnp.float32)
    w_norm = w / jnp.sum(w)
    if Y:
        gray = jnp.array([0.2989, 0.587, 0.114], dtype=jnp.float32)
        w_eff = (1.0 - float(alpha)) * w_norm + float(alpha) * gray
    else:
        w_eff = w_norm

    # --- Sublane+lane dense layout: spatial axis -> (n_rows, 128) ---
    hw_128 = _round_up(HW, 128)
    n_rows = hw_128 // 128

    x = image.reshape(N, 3, HW)
    if hw_128 != HW:
        # Minimal 128-lane alignment pad only (no tile-multiple padding).
        x = jnp.pad(x, ((0, 0), (0, 0), (0, hw_128 - HW)))
    x = x.reshape(N, 3, n_rows, 128)

    # --- Tile selection ---
    if n_rows > _MAX_ROWS:
        bn, r_tile = 1, _MAX_ROWS
    else:
        # Small/medium images: whole spatial extent per step, pack batch items
        # so each step moves enough bytes to amortize per-step overhead.
        r_tile = n_rows
        bn = max(1, min(N, _MAX_ROWS // max(n_rows, 1)))
    n_b = pl.cdiv(N, bn)
    n_r = pl.cdiv(n_rows, r_tile)

    # Megacore (v7x has 2 TensorCores): expose >= 2 grid programs when possible.
    if n_b * n_r < 2:
        if N >= 2:
            bn = pl.cdiv(N, 2)
            n_b = pl.cdiv(N, bn)
        elif n_rows >= 16:
            r_tile = _round_up(pl.cdiv(n_rows, 2), 8)
            n_r = pl.cdiv(n_rows, r_tile)

    grid_spec = pltpu.PrefetchScalarGridSpec(
        num_scalar_prefetch=1,            # w_eff -> SMEM, passed as w_ref
        grid=(n_b, n_r),
        in_specs=[
            pl.BlockSpec((bn, 3, r_tile, 128), lambda b, r, _w: (b, 0, r, 0)),
        ],
        out_specs=pl.BlockSpec((bn, 1, r_tile, 128), lambda b, r, _w: (b, 0, r, 0)),
    )

    out = pl.pallas_call(
        _color_shift_kernel,
        out_shape=jax.ShapeDtypeStruct((N, 1, n_rows, 128), dtype),
        grid_spec=grid_spec,
        compiler_params=pltpu.CompilerParams(
            dimension_semantics=("parallel", "parallel"),
            vmem_limit_bytes=48 * 1024 * 1024,   # 16 MiB working set + headroom
        ),
    )(w_eff, x)

    out = out.reshape(N, 1, hw_128)
    if hw_128 != HW:
        out = out[:, :, :HW]
    return out.reshape(N, 1, H, W)


class ColorShift:
    """JAX/Pallas port of the PyTorch ColorShift module (channels='single')."""

    def __init__(self, mode="uniform", alpha=0.8, Y=False, seed=0):
        self.mode = mode
        self.alpha = alpha
        self.Y = Y
        self._rng = np.random.RandomState(seed)

    def __call__(self, *imgs: jax.Array):
        # Same weights shared across all images of one forward call,
        # matching the PyTorch module (which samples once in forward()).
        rgb_weights = get_colorshift_weights(self._rng, mode=self.mode, Y=self.Y)
        return tuple(
            color_shift_pallas(im, rgb_weights, Y=self.Y, alpha=self.alpha)
            for im in imgs
        )


def _reference_color_shift(image, rgb_weights, Y=False, alpha=0.8):
    """Pure-JAX reference mirroring the PyTorch code for validation."""
    img = image.astype(jnp.float32)
    r = img[..., 0:1, :, :]
    g = img[..., 1:2, :, :]
    b = img[..., 2:3, :, :]
    out = (rgb_weights[0] * r + rgb_weights[1] * g + rgb_weights[2] * b) / rgb_weights.sum()
    if Y:
        gray = 0.2989 * r + 0.587 * g + 0.114 * b
        out = (1.0 - alpha) * out + alpha * gray
    return out.astype(image.dtype)


if __name__ == "__main__":
    key = jax.random.PRNGKey(0)
    k1, k2, k3 = jax.random.split(key, 3)

    # Small NCHW RGB image batches:
    #   x1: 128-aligned spatial (16*16=256) -> no pad, batch-packed blocks
    #   x2: non-aligned spatial (24*24=576) -> exercises the 128-alignment pad path
    #   x3: N=1, 128-aligned (72*96=6912)   -> exercises the row-split / ragged-row path
    x1 = jax.random.uniform(k1, (2, 3, 16, 16), dtype=jnp.float32)
    x2 = jax.random.uniform(k2, (2, 3, 24, 24), dtype=jnp.float32)
    x3 = jax.random.uniform(k3, (1, 3, 72, 96), dtype=jnp.float32)

    # --- Y=False path (module default) ---
    shifter = ColorShift(mode="uniform", alpha=0.8, Y=False, seed=0)
    outs = shifter(x1, x2, x3)
    outs = jax.block_until_ready(outs)

    ref_rng = np.random.RandomState(0)
    w = get_colorshift_weights(ref_rng, mode="uniform", Y=False)
    for x, o in zip((x1, x2, x3), outs):
        ref = _reference_color_shift(x, w, Y=False, alpha=0.8)
        assert o.shape == (x.shape[0], 1, x.shape[2], x.shape[3])
        assert o.dtype == x.dtype
        np.testing.assert_allclose(np.asarray(o), np.asarray(ref), rtol=1e-5, atol=1e-6)

    # --- Y=True path (checks folded grayscale-blend weights) ---
    shifter_y = ColorShift(mode="uniform", alpha=0.8, Y=True, seed=1)
    (out_y,) = shifter_y(x1)
    out_y = jax.block_until_ready(out_y)
    ref_rng_y = np.random.RandomState(1)
    wy = get_colorshift_weights(ref_rng_y, mode="uniform", Y=True)
    ref_y = _reference_color_shift(x1, wy, Y=True, alpha=0.8)
    np.testing.assert_allclose(np.asarray(out_y), np.asarray(ref_y), rtol=1e-5, atol=1e-5)

    print("KERNEL_OK")
</pallas_src>

<mosaic_0001>
module attributes {stable_mosaic.version = 11 : i64} {
  func.func @_color_shift_kernel(%arg0: i32, %arg1: i32, %arg2: memref<3xf32, #tpu.memory_space<smem>>, %arg3: memref<1x3x2x128xf32, #tpu.memory_space<vmem>>, %arg4: memref<1x1x2x128xf32, #tpu.memory_space<vmem>>) attributes {dimension_semantics = [#tpu.dimension_semantics<parallel>, #tpu.dimension_semantics<parallel>], iteration_bounds = array<i64: 2, 1>, scalar_prefetch = 1 : i64, scratch_operands = 0 : i64, tpu.core_type = #tpu.core_type<tc>, window_params = [{transform_indices = @transform_0, window_bounds = array<i64: 1, 3, 2, 128>}, {transform_indices = @transform_1, window_bounds = array<i64: 1, 1, 2, 128>}]} {
    %c0 = arith.constant 0 : index
    %0 = memref.load %arg2[%c0] : memref<3xf32, #tpu.memory_space<smem>>
    %c1 = arith.constant 1 : index
    %1 = memref.load %arg2[%c1] : memref<3xf32, #tpu.memory_space<smem>>
    %c2 = arith.constant 2 : index
    %2 = memref.load %arg2[%c2] : memref<3xf32, #tpu.memory_space<smem>>
    %c0_0 = arith.constant 0 : index
    %c0_1 = arith.constant 0 : index
    %c0_2 = arith.constant 0 : index
    %c0_3 = arith.constant 0 : index
    %3 = vector.load %arg3[%c0_0, %c0_1, %c0_2, %c0_3] : memref<1x3x2x128xf32, #tpu.memory_space<vmem>>, vector<1x1x2x128xf32>
    %4 = vector.shape_cast %3 : vector<1x1x2x128xf32> to vector<1x2x128xf32>
    %c0_4 = arith.constant 0 : index
    %c1_5 = arith.constant 1 : index
    %c0_6 = arith.constant 0 : index
    %c0_7 = arith.constant 0 : index
    %5 = vector.load %arg3[%c0_4, %c1_5, %c0_6, %c0_7] : memref<1x3x2x128xf32, #tpu.memory_space<vmem>>, vector<1x1x2x128xf32>
    %6 = vector.shape_cast %5 : vector<1x1x2x128xf32> to vector<1x2x128xf32>
    %c0_8 = arith.constant 0 : index
    %c2_9 = arith.constant 2 : index
    %c0_10 = arith.constant 0 : index
    %c0_11 = arith.constant 0 : index
    %7 = vector.load %arg3[%c0_8, %c2_9, %c0_10, %c0_11] : memref<1x3x2x128xf32, #tpu.memory_space<vmem>>, vector<1x1x2x128xf32>
    %8 = vector.shape_cast %7 : vector<1x1x2x128xf32> to vector<1x2x128xf32>
    %9 = vector.broadcast %0 : f32 to vector<1x2x128xf32>
    %10 = arith.mulf %9, %4 : vector<1x2x128xf32>
    %11 = vector.broadcast %1 : f32 to vector<1x2x128xf32>
    %12 = arith.mulf %11, %6 : vector<1x2x128xf32>
    %13 = arith.addf %10, %12 : vector<1x2x128xf32>
    %14 = vector.broadcast %2 : f32 to vector<1x2x128xf32>
    %15 = arith.mulf %14, %8 : vector<1x2x128xf32>
    %16 = arith.addf %13, %15 : vector<1x2x128xf32>
    %c0_12 = arith.constant 0 : index
    %c0_13 = arith.constant 0 : index
    %c0_14 = arith.constant 0 : index
    %c0_15 = arith.constant 0 : index
    %17 = vector.load %arg4[%c0_12, %c0_13, %c0_14, %c0_15] : memref<1x1x2x128xf32, #tpu.memory_space<vmem>>, vector<1x1x2x128xf32>
    %18 = vector.shape_cast %17 : vector<1x1x2x128xf32> to vector<1x2x128xf32>
    %19 = vector.shape_cast %16 : vector<1x2x128xf32> to vector<1x1x2x128xf32>
    tpu.vector_store %arg4[%c0_12, %c0_13, %c0_14, %c0_15], %19 {strides = array<i32>} : memref<1x1x2x128xf32, #tpu.memory_space<vmem>>, vector<1x1x2x128xf32>,
    return
  }
  func.func @transform_0(%arg0: i32, %arg1: i32, %arg2: memref<3xf32, #tpu.memory_space<smem>>) -> (i32, i32, i32, i32) {
    %c0_i32 = arith.constant 0 : i32
    %c0_i32_0 = arith.constant 0 : i32
    %c0_i32_1 = arith.constant 0 : i32
    return %arg0, %c0_i32, %arg1, %c0_i32_0 : i32, i32, i32, i32
  }
  func.func @transform_1(%arg0: i32, %arg1: i32, %arg2: memref<3xf32, #tpu.memory_space<smem>>) -> (i32, i32, i32, i32) {
    %c0_i32 = arith.constant 0 : i32
    %c0_i32_0 = arith.constant 0 : i32
    %c0_i32_1 = arith.constant 0 : i32
    return %arg0, %c0_i32, %arg1, %c0_i32_0 : i32, i32, i32, i32
  }
}

</mosaic_0001>

<bundles_post_ra>
// kernel: color_shift_pallas.1
= control target key start
LH: loop header
LB: loop body
LE: loop exit
PB: predicated region body
PF: predicated region fallthrough
CT: control target
= control target key end

     0   :  { %s326_s12 = smov [#allocation3]   ;;  %s375_s0 = inlined_call_operand.vmem [shape: f32[3], index: 0, kind: input, shape index: {}]   ;;  %s376_s1 = inlined_call_operand.vmem [shape: f32[2,3,2,128], index: 1, kind: input, shape index: {}]   ;;  %s377_s2 = inlined_call_operand.vmem [shape: f32[2,1,2,128], index: 2, kind: output, shape index: {}]  }
   0x1   :  { %s8_s11 = sshll.u32 %s375_s0, 4  ;;  %s9_s11 = int_to_ptr.vmem [resolvable:$true] %s8_s11 }
   0x2   :  { %11 = dma.vmem_to_smem %s9_s11, 16, %s326_s12, [#allocation2] }
   0x3   :  { %312 = dma.done.wait [#allocation2], 16 }
   0x4   :  { %313 = vsyncadd [#allocation2], 4294967280 }
   0x5   :  { %14 = sfence }
   0x6   :  { %s345_s13 = smov 0   ;;  %s347_s14 = smov 0  }
   0x7   :  { %s349_s15 = smov 0  }
   0x8 LB: > { %s32_s0 = sadd.s32 1, %s320_s14  ;;  %p253_p0 = scmp.ge.s32.totalorder %s324_s15, 1  ;;  %s324_s15 = sphi %s349_s15, %s20_s15   ;;  %s320_s14 = sphi %s347_s14, %s379_s14   ;;  %s316_s13 = sphi %s345_s13, %s378_s13  }
   0x9   : > { %p34_p1 = scmp.ge.s32.totalorder %s32_s0, 2  ;;  %p115_p2 = scmp.lt.s32.totalorder %s324_s15, 3 }
   0xb   : > { %s381_s0 = smov (%p34_p1, %s32_s0), 0  ;;  %p116_p3 = pnand %p253_p0, %p115_p2 }
   0xc   : > { %p140_p4 = scmp.lt.s32.totalorder (!%p116_p3), %s316_s13, 1  ;;  %s155_s16 = sld [smem:[#allocation3]] (!%p116_p3) }
   0xd   : > { %119 = sbr.rel (%p116_p3) target bundleno = 30 (0x1e), region = 24  ;;  %s256_s17 = sld [smem:[#allocation3 + $0x1]] (!%p116_p3) }
   0xe   : > { %s257_s18 = sld [smem:[#allocation3 + $0x2]] (!%p116_p3) }
  0x12   : > { %s383_s13 = smov (!%p140_p4, %s316_s13), 1  ;;  %v163_v0 = vstv %s155_s16 }
  0x13   : > { %s262_s19 = smul.u32 6, %s383_s13  ;;  %v165_v4 = vstv %s256_s17  ;;  %s255_s23 = sshll.u32 %s383_s13, 1 }
  0x14   : > { %v168_v7 = vstv %s257_s18  ;;  %s154_s26 = scalar_lea.vmem %s377_s2, %s255_s23 }
  0x15   : > { %s147_s22 = scalar_lea.vmem %s376_s1, %s262_s19 }
  0x16   : > { %v158_v1 = vld [vmem:[%s147_s22] sm:$0x3]  ;;  %v258_v2 = vld [vmem:[%s147_s22 + $0x2] sm:$0x3]  ;;  %v259_v3 = vld [vmem:[%s147_s22 + $0x4] sm:$0x3] }
  0x17   : > { %v164_v5 = vmul.f32 %v163_v0, %v158_v1  ;;  %v166_v6 = vmul.f32 %v258_v2, %v165_v4  ;;  %v169_v9 = vmul.f32 %v259_v3, %v168_v7 }
  0x19   : > { %v167_v8 = vadd.f32 %v166_v6, %v164_v5 }
  0x1b   : > { %v170_v10 = vadd.f32 %v169_v9, %v167_v8 }
  0x1d   : > { %171 = vst [vmem:[%s154_s26] sm:$0x3] %v170_v10 }
  0x1e PF: > { %s20_s15 = sadd.s32 1, %s324_s15   ;;  %s378_s13 = smov %s320_s14 }
  0x1f   : > { %p17_p5 = scmp.ge.s32.totalorder %s20_s15, 4   ;;  %s379_s14 = smov %s381_s0 }
  0x21   :  { %19 = sbr.rel (!%p17_p5) target bundleno = 8 (0x8), region = 56 }

</bundles_post_ra>
